<compile_context>
chip_gen: v7x
topology: tpu7x:2x2x1
jax: 0.10.0
libtpu: 0.0.40
codegen_flags: <defaults>
</compile_context>

<pallas_src>
import jax
import jax.numpy as jnp
from jax.experimental import pallas as pl
from jax.experimental.pallas import tpu as pltpu


def _align(n, m):
    return ((n + m - 1) // m) * m


# ---------------------------------------------------------------------------
# Kernel
# ---------------------------------------------------------------------------
def make_kernel(dims, offsets):
    state_size, fc1, fc2_adv, fc2_val, action_size = dims
    fc2_total = fc2_adv + fc2_val
    off1, off2, off3, offb = offsets
    inv_a = 1.0 / float(action_size)

    def kernel(x_ref, p_ref, out_ref):
        x = x_ref[...]                                           # (TILE_B, S)

        # Static sub-views of the single packed parameter slab (8-row aligned).
        w1 = p_ref[off1:off1 + state_size, 0:fc1]                # (S, fc1)
        w2 = p_ref[off2:off2 + fc1, 0:fc2_total]                 # (fc1, fc2a+fc2v)
        w3 = p_ref[off3:off3 + fc2_total, :]                     # (fc2a+fc2v, 128)
        b1 = p_ref[offb:offb + 1, 0:fc1]                         # (1, fc1)
        b2 = p_ref[offb + 8:offb + 9, 0:fc2_total]               # (1, fc2_total)
        b3 = p_ref[offb + 16:offb + 17, :]                       # (1, 128)

        # fc1 + relu
        h1 = jnp.maximum(
            jnp.dot(x, w1, preferred_element_type=jnp.float32) + b1, 0.0)
        # fused fc2_adv|fc2_val + relu (one MXU pass for both streams)
        h2 = jnp.maximum(
            jnp.dot(h1, w2, preferred_element_type=jnp.float32) + b2, 0.0)
        # fused fc3 via block-diagonal weights, padded to a full 128-lane output:
        # cols [0:A] = advantage, col [A] = value, cols [A+1:] = zeros.
        q_raw = jnp.dot(h2, w3, preferred_element_type=jnp.float32) + b3

        adv = q_raw[:, :action_size]                             # (TILE_B, A) only!
        val = q_raw[:, action_size:action_size + 1]              # (TILE_B, 1)
        adv_mean = jnp.sum(adv, axis=-1, keepdims=True) * inv_a  # excludes val/padding

        # Lane-dense (unmasked) store of the full 128-column block.
        # cols [0:A]  = val + adv - mean   (the real Q-values)
        # cols [A: ]  = garbage, sliced off on the host.
        out_ref[...] = q_raw + (val - adv_mean)

    return kernel


# ---------------------------------------------------------------------------
# Host-side parameter packing (single slab, 128-lane wide)
# ---------------------------------------------------------------------------
def pack_params(raw, dims):
    state_size, fc1, fc2_adv, fc2_val, action_size = dims
    (w1, b1, w2a, b2a, w2v, b2v, w3a, b3a, w3v, b3v) = raw
    fc2_total = fc2_adv + fc2_val
    n_out3 = action_size + 1
    slab_cols = _align(max(fc1, fc2_total, n_out3, 128), 128)    # full-lane slab

    # Fused layer-2 weights / biases.
    w2 = jnp.concatenate([w2a, w2v], axis=1)                     # (fc1, fc2_total)
    b2 = jnp.concatenate([b2a, b2v], axis=1)                     # (1, fc2_total)
    # Block-diagonal layer-3 weights / concatenated biases (value rides along).
    w3 = jnp.zeros((fc2_total, n_out3), jnp.float32)
    w3 = w3.at[:fc2_adv, :action_size].set(w3a)
    w3 = w3.at[fc2_adv:, action_size:].set(w3v)
    b3 = jnp.concatenate([b3a, b3v], axis=1)                     # (1, A+1)

    def pad_cols(a):
        return jnp.pad(a, ((0, 0), (0, slab_cols - a.shape[1])))

    off1 = 0
    off2 = _align(off1 + state_size, 8)
    off3 = _align(off2 + fc1, 8)
    offb = _align(off3 + fc2_total, 8)          # bias rows: offb, offb+8, offb+16
    total_rows = _align(offb + 17, 8)

    slab = jnp.zeros((total_rows, slab_cols), jnp.float32)
    slab = slab.at[off1:off1 + state_size].set(pad_cols(w1))
    slab = slab.at[off2:off2 + fc1].set(pad_cols(w2))
    slab = slab.at[off3:off3 + fc2_total].set(pad_cols(w3))
    slab = slab.at[offb:offb + 1].set(pad_cols(b1))
    slab = slab.at[offb + 8:offb + 9].set(pad_cols(b2))
    slab = slab.at[offb + 16:offb + 17].set(pad_cols(b3))

    return slab, (off1, off2, off3, offb)


# ---------------------------------------------------------------------------
# Wrapper
# ---------------------------------------------------------------------------
def dueling_dqn_forward(x, p_slab, offsets, dims, *, tile_b=128):
    state_size, fc1, fc2_adv, fc2_val, action_size = dims
    B = x.shape[0]
    n_tiles = pl.cdiv(B, tile_b)
    Bp = n_tiles * tile_b
    if Bp != B:
        x = jnp.pad(x, ((0, Bp - B), (0, 0)))
    out_cols = p_slab.shape[1]                                   # 128-lane dense output

    kernel = make_kernel(dims, offsets)
    out = pl.pallas_call(
        kernel,
        out_shape=jax.ShapeDtypeStruct((Bp, out_cols), jnp.float32),
        grid=(n_tiles,),
        in_specs=[
            pl.BlockSpec((tile_b, state_size), lambda i: (i, 0)),
            pl.BlockSpec(p_slab.shape, lambda i: (0, 0)),        # resident weights
        ],
        out_specs=pl.BlockSpec((tile_b, out_cols), lambda i: (i, 0)),
        compiler_params=pltpu.CompilerParams(
            dimension_semantics=("parallel",)),
    )(x, p_slab)
    return out[:B, :action_size]


# ---------------------------------------------------------------------------
# Parameter init (PyTorch nn.Linear-style uniform fan-in init) + reference
# ---------------------------------------------------------------------------
def init_raw_params(key, state_size, fc1_nodes, fc2_adv, fc2_val, action_size):
    def linear(k, fan_in, fan_out):
        k_w, k_b = jax.random.split(k)
        bound = 1.0 / jnp.sqrt(fan_in)
        w = jax.random.uniform(k_w, (fan_in, fan_out), jnp.float32, -bound, bound)
        b = jax.random.uniform(k_b, (1, fan_out), jnp.float32, -bound, bound)
        return w, b

    ks = jax.random.split(key, 5)
    w1, b1 = linear(ks[0], state_size, fc1_nodes)
    w2a, b2a = linear(ks[1], fc1_nodes, fc2_adv)
    w2v, b2v = linear(ks[2], fc1_nodes, fc2_val)
    w3a, b3a = linear(ks[3], fc2_adv, action_size)
    w3v, b3v = linear(ks[4], fc2_val, 1)                 # (fc2_val, 1), (1, 1)
    return (w1, b1, w2a, b2a, w2v, b2v, w3a, b3a, w3v, b3v)


def reference_forward(x, raw):
    """Independent (unfused, per-stream Linear) reference of the PyTorch forward."""
    (w1, b1, w2a, b2a, w2v, b2v, w3a, b3a, w3v, b3v) = raw
    hp = jax.lax.Precision.HIGHEST
    h = jax.nn.relu(jnp.dot(x, w1, precision=hp) + b1)
    adv = jnp.dot(jax.nn.relu(jnp.dot(h, w2a, precision=hp) + b2a),
                  w3a, precision=hp) + b3a
    val = jnp.dot(jax.nn.relu(jnp.dot(h, w2v, precision=hp) + b2v),
                  w3v, precision=hp) + b3v               # (B, 1)
    return val + adv - jnp.mean(adv, axis=-1, keepdims=True)


if __name__ == "__main__":
    # config equivalents (batched to B=128 -> grid=(1,), full MXU sublane fill)
    batch = 128
    state_size = 16
    fc1_nodes = 64
    fc2_adv = 32
    fc2_val = 32
    action_size = 8
    dims = (state_size, fc1_nodes, fc2_adv, fc2_val, action_size)

    key = jax.random.PRNGKey(0)
    k_x, k_p = jax.random.split(key)
    x = jax.random.normal(k_x, (batch, state_size), dtype=jnp.float32)

    raw = init_raw_params(k_p, state_size, fc1_nodes, fc2_adv, fc2_val, action_size)
    p_slab, offsets = pack_params(raw, dims)

    q = dueling_dqn_forward(x, p_slab, offsets, dims, tile_b=128)
    q = jax.block_until_ready(q)

    q_ref = reference_forward(x, raw)
    assert q.shape == (batch, action_size)
    assert jnp.allclose(q, q_ref, atol=1e-3, rtol=1e-3), "mismatch vs reference"

    print("KERNEL_OK")
</pallas_src>

<mosaic_0001>
module attributes {stable_mosaic.version = 11 : i64} {
  func.func @kernel(%arg0: i32, %arg1: memref<128x16xf32, #tpu.memory_space<vmem>>, %arg2: memref<168x128xf32, #tpu.memory_space<vmem>>, %arg3: memref<128x128xf32, #tpu.memory_space<vmem>>) attributes {dimension_semantics = [#tpu.dimension_semantics<parallel>], iteration_bounds = array<i64: 1>, scalar_prefetch = 0 : i64, scratch_operands = 0 : i64, tpu.core_type = #tpu.core_type<tc>, window_params = [{transform_indices = @transform_0, window_bounds = array<i64: 128, 16>}, {pipeline_mode = #tpu.pipeline_mode<synchronous>, transform_indices = @transform_1, window_bounds = array<i64: 168, 128>}, {transform_indices = @transform_2, window_bounds = array<i64: 128, 128>}]} {
    %c0 = arith.constant 0 : index
    %c0_0 = arith.constant 0 : index
    %0 = vector.load %arg1[%c0, %c0_0] : memref<128x16xf32, #tpu.memory_space<vmem>>, vector<128x16xf32>
    %c0_1 = arith.constant 0 : index
    %c0_2 = arith.constant 0 : index
    %1 = vector.load %arg2[%c0_1, %c0_2] : memref<168x128xf32, #tpu.memory_space<vmem>>, vector<16x64xf32>
    %c16 = arith.constant 16 : index
    %c0_3 = arith.constant 0 : index
    %2 = vector.load %arg2[%c16, %c0_3] : memref<168x128xf32, #tpu.memory_space<vmem>>, vector<64x64xf32>
    %c80 = arith.constant 80 : index
    %c0_4 = arith.constant 0 : index
    %3 = vector.load %arg2[%c80, %c0_4] : memref<168x128xf32, #tpu.memory_space<vmem>>, vector<64x128xf32>
    %c144 = arith.constant 144 : index
    %c0_5 = arith.constant 0 : index
    %4 = vector.load %arg2[%c144, %c0_5] : memref<168x128xf32, #tpu.memory_space<vmem>>, vector<1x64xf32>
    %c152 = arith.constant 152 : index
    %c0_6 = arith.constant 0 : index
    %5 = vector.load %arg2[%c152, %c0_6] : memref<168x128xf32, #tpu.memory_space<vmem>>, vector<1x64xf32>
    %c160 = arith.constant 160 : index
    %c0_7 = arith.constant 0 : index
    %6 = vector.load %arg2[%c160, %c0_7] : memref<168x128xf32, #tpu.memory_space<vmem>>, vector<1x128xf32>
    %cst = arith.constant dense<0.000000e+00> : vector<128x64xf32>
    %7 = tpu.matmul %0, %1, %cst {dimension_numbers = #tpu.dot_dimension_numbers<[1], [0], [0], [1], [0, 0, 1, 1], [], []>} : vector<128x16xf32>, vector<16x64xf32>, vector<128x64xf32> -> vector<128x64xf32>
    %8 = vector.broadcast %4 : vector<1x64xf32> to vector<128x64xf32>
    %9 = arith.addf %7, %8 : vector<128x64xf32>
    %cst_8 = arith.constant 0.000000e+00 : f32
    %10 = vector.broadcast %cst_8 : f32 to vector<128x64xf32>
    %11 = arith.maximumf %9, %10 : vector<128x64xf32>
    %cst_9 = arith.constant dense<0.000000e+00> : vector<128x64xf32>
    %12 = tpu.matmul %11, %2, %cst_9 {dimension_numbers = #tpu.dot_dimension_numbers<[1], [0], [0], [1], [0, 0, 1, 1], [], []>} : vector<128x64xf32>, vector<64x64xf32>, vector<128x64xf32> -> vector<128x64xf32>
    %13 = vector.broadcast %5 : vector<1x64xf32> to vector<128x64xf32>
    %14 = arith.addf %12, %13 : vector<128x64xf32>
    %cst_10 = arith.constant 0.000000e+00 : f32
    %15 = vector.broadcast %cst_10 : f32 to vector<128x64xf32>
    %16 = arith.maximumf %14, %15 : vector<128x64xf32>
    %cst_11 = arith.constant dense<0.000000e+00> : vector<128x128xf32>
    %17 = tpu.matmul %16, %3, %cst_11 {dimension_numbers = #tpu.dot_dimension_numbers<[1], [0], [0], [1], [0, 0, 1, 1], [], []>} : vector<128x64xf32>, vector<64x128xf32>, vector<128x128xf32> -> vector<128x128xf32>
    %18 = vector.broadcast %6 : vector<1x128xf32> to vector<128x128xf32>
    %19 = arith.addf %17, %18 : vector<128x128xf32>
    %20 = vector.extract_strided_slice %19 {offsets = [0, 0], sizes = [128, 8], strides = [1, 1]} : vector<128x128xf32> to vector<128x8xf32>
    %21 = vector.extract_strided_slice %19 {offsets = [0, 8], sizes = [128, 1], strides = [1, 1]} : vector<128x128xf32> to vector<128x1xf32>
    %cst_12 = arith.constant dense<0.000000e+00> : vector<128xf32>
    %22 = vector.multi_reduction <add>, %20, %cst_12 [1] : vector<128x8xf32> to vector<128xf32>
    %23 = vector.shape_cast %22 : vector<128xf32> to vector<128x1xf32>
    %cst_13 = arith.constant 1.250000e-01 : f32
    %24 = vector.broadcast %cst_13 : f32 to vector<128x1xf32>
    %25 = arith.mulf %23, %24 : vector<128x1xf32>
    %26 = arith.subf %21, %25 : vector<128x1xf32>
    %27 = vector.broadcast %26 : vector<128x1xf32> to vector<128x128xf32>
    %28 = arith.addf %19, %27 : vector<128x128xf32>
    %c0_14 = arith.constant 0 : index
    %c0_15 = arith.constant 0 : index
    %29 = vector.load %arg3[%c0_14, %c0_15] : memref<128x128xf32, #tpu.memory_space<vmem>>, vector<128x128xf32>
    tpu.vector_store %arg3[%c0_14, %c0_15], %28 {strides = array<i32>} : memref<128x128xf32, #tpu.memory_space<vmem>>, vector<128x128xf32>,
    return
  }
  func.func @transform_0(%arg0: i32) -> (i32, i32) {
    %c0_i32 = arith.constant 0 : i32
    %c0_i32_0 = arith.constant 0 : i32
    return %arg0, %c0_i32 : i32, i32
  }
  func.func @transform_1(%arg0: i32) -> (i32, i32) {
    %c0_i32 = arith.constant 0 : i32
    %c0_i32_0 = arith.constant 0 : i32
    %c0_i32_1 = arith.constant 0 : i32
    return %c0_i32, %c0_i32_0 : i32, i32
  }
  func.func @transform_2(%arg0: i32) -> (i32, i32) {
    %c0_i32 = arith.constant 0 : i32
    %c0_i32_0 = arith.constant 0 : i32
    return %arg0, %c0_i32 : i32, i32
  }
}

</mosaic_0001>

<bundles_post_ra>
// kernel: tpu_custom_call.1
= control target key start
LH: loop header
LB: loop body
LE: loop exit
PB: predicated region body
PF: predicated region fallthrough
CT: control target
= control target key end

     0   :  { %7 = vsyncpa [#allocation3], 0  ;;  %s1476_s0 = inlined_call_operand.vmem [shape: f32[128,16], index: 0, kind: input, shape index: {}]   ;;  %s1477_s1 = inlined_call_operand.hbm [shape: f32[168,128], index: 1, kind: input, shape index: {}]   ;;  %s1478_s2 = inlined_call_operand.hbm [shape: f32[128,128], index: 2, kind: output, shape index: {}]  }
   0x1   :  { %8 = vsyncpa [#allocation4], 0  ;;  %s1216_s9 = smov [#allocation2]   ;;  %s1168_s13 = scalar_lea.hbm %s1477_s1, 2688 }
   0x2   :  { %s16_s10 = sshll.u32 %s1216_s9, 4  ;;  %p1169_p0 = scmp.ne.s32.totalorder %s1477_s1, %s1168_s13  ;;  %s17_s10 = int_to_ptr.vmem [resolvable:$true] %s16_s10 }
   0x3   :  { %p1172_p1 = scmp.lt.u32.totalorder %s1168_s13, %s1477_s1 }
   0x5   :  { %p1174_p2 = pnand %p1172_p1, %p1169_p0 }
   0x7   :  { %1177 = shalt.err (!%p1174_p2)
}
   0x8   :  { %s1178_s18 = scalar_lea.vmem %s17_s10, 2688  ;;  %p1183_p4 = scmp.lt.s32.totalorder %s17_s10, %s17_s10 }
   0x9   :  { %p1179_p3 = scmp.ne.s32.totalorder %s17_s10, %s1178_s18  ;;  %p1184_p5 = scmp.lt.s32.totalorder %s1178_s18, %s1178_s18 }
   0xb   :  { %p1185_p6 = por %p1184_p5, %p1183_p4 }
   0xd   :  { %p1186_p7 = pnand %p1185_p6, %p1179_p3 }
   0xf   :  { %1189 = shalt.err (!%p1186_p7)
}
  0x10   :  { %s1217_s19 = smov 128   ;;  %s1218_s20 = smov 8  }
  0x11   :  { %22 = dma.hbm_to_vmem [thread:$0]  %s1477_s1, 2688, %s17_s10, [#allocation3], %s1217_s19, %s1217_s19, %s1218_s20  }
  0x12   :  { %1212 = dma.done.wait [#allocation3], 2688  }
  0x13   :  { %1213 = vsyncadd [#allocation3], 4294964608  ;;  %vm67_vm0 = vcmask 130048   ;;  %v42_v0 = vld [vmem:[#allocation2] sm:$0xff]  ;;  %v43_v1 = vld [vmem:[#allocation2 + $0x8] sm:$0xff]  ;;  %vm281_vm1 = vcmask 523264  }
  0x14   :  { %v26_v2 = vld [vmem:[%s1476_s0] sm:$0xff]  ;;  %v1123_v3 = vpack.c.bf16 %v43_v1, %v42_v0  ;;  %v27_v5 = vld [vmem:[%s1476_s0 + $0x8] sm:$0xff]  ;;  %v28_v7 = vld [vmem:[%s1476_s0 + $0x10] sm:$0xff]  ;;  %vm688_vm2 = vcmask 64512  }
  0x15   :  { %1019 = vmatprep.mubr.msk.f32.mxu0 %vm67_vm0, %v26_v2  ;;  %v34_v4 = vld [vmem:[%s1476_s0 + $0x40] sm:$0xff]  ;;  %v35_v6 = vld [vmem:[%s1476_s0 + $0x48] sm:$0xff]  ;;  %v36_v8 = vld [vmem:[%s1476_s0 + $0x50] sm:$0xff] }
  0x16   :  { %1124 = vmatprep.subr.bf16.mxu0 %v1123_v3  ;;  %1159 = vmatprep.subr.bf16.mxu1 %v1123_v3  ;;  %v44_v9 = vld [vmem:[#allocation2 + $0x10] sm:$0xff]  ;;  %v45_v10 = vld [vmem:[#allocation2 + $0x18] sm:$0xff]  ;;  %v46_v11 = vld [vmem:[#allocation2 + $0x20] sm:$0xff] }
  0x17   :  { %1126 = vmatpush3.bf16.msra.mxu0 %v1123_v3  ;;  %1160 = vmatpush3.bf16.msra.mxu1 %v1123_v3  ;;  %v1127_v12 = vpack.c.bf16 %v45_v10, %v44_v9  ;;  %v47_v13 = vld [vmem:[#allocation2 + $0x28] sm:$0xff]  ;;  %v29_v14 = vld [vmem:[%s1476_s0 + $0x18] sm:$0xff]  ;;  %v30_v16 = vld [vmem:[%s1476_s0 + $0x20] sm:$0xff] }
  0x18   :  { %1031 = vmatprep.mubr.msk.f32.mxu1 %vm67_vm0, %v34_v4  ;;  %v37_v15 = vld [vmem:[%s1476_s0 + $0x58] sm:$0xff]  ;;  %v38_v17 = vld [vmem:[%s1476_s0 + $0x60] sm:$0xff]  ;;  %v1131_v18 = vpack.c.bf16 %v47_v13, %v46_v11  ;;  %v48_v19 = vld [vmem:[#allocation2 + $0x30] sm:$0xff] }
  0x19   :  { %1128 = vmatprep.subr.bf16.mxu1 %v1127_v12  ;;  %v49_v20 = vld [vmem:[#allocation2 + $0x38] sm:$0xff]  ;;  %v31_v21 = vld [vmem:[%s1476_s0 + $0x28] sm:$0xff]  ;;  %v32_v23 = vld [vmem:[%s1476_s0 + $0x30] sm:$0xff] }
  0x1a   :  { %1020 = vmatmul.mubr.msk.f32.vlgmr.msra.gmra.mrb[0].mxu0 %vm67_vm0, %v27_v5  ;;  %1032 = vmatmul.mubr.msk.f32.vlgmr.msra.gmra.mrb[0].mxu1 %vm67_vm0, %v35_v6  ;;  %v39_v22 = vld [vmem:[%s1476_s0 + $0x68] sm:$0xff]  ;;  %v40_v24 = vld [vmem:[%s1476_s0 + $0x70] sm:$0xff]  ;;  %v1135_v25 = vpack.c.bf16 %v49_v20, %v48_v19  ;;  %v33_v26 = vld [vmem:[%s1476_s0 + $0x38] sm:$0xff] }
  0x1b   :  { %1022 = vmatprep.mubr.msk.f32.mxu0 %vm67_vm0, %v28_v7  ;;  %1034 = vmatprep.mubr.msk.f32.mxu1 %vm67_vm0, %v36_v8  ;;  %v41_v27 = vld [vmem:[%s1476_s0 + $0x78] sm:$0xff]  ;;  %v50_v28 = vld [vmem:[#allocation2 + $0x40] sm:$0xff]  ;;  %v51_v29 = vld [vmem:[#allocation2 + $0x48] sm:$0xff]  ;;  %s1220_s0 = smov [#allocation5]  }
  0x1c   :  { %1130 = vmatpush3.bf16.msra.mxu1 %v1127_v12  ;;  %v1139_v30 = vpack.c.bf16 %v51_v29, %v50_v28  ;;  %v52_v31 = vld [vmem:[#allocation2 + $0x50] sm:$0xff]  ;;  %v53_v32 = vld [vmem:[#allocation2 + $0x58] sm:$0xff]  ;;  %v54_v33 = vld [vmem:[#allocation2 + $0x60] sm:$0xff]  ;;  %s886_s27 = sshll.u32 %s1220_s0, 4  ;;  %s887_s27 = int_to_ptr.vmem [resolvable:$true] %s886_s27 }
  0x1d   :  { %1132 = vmatprep.subr.bf16.mxu1 %v1131_v18  ;;  %v1143_v34 = vpack.c.bf16 %v53_v32, %v52_v31  ;;  %v55_v35 = vld [vmem:[#allocation2 + $0x68] sm:$0xff]  ;;  %v56_v37 = vld [vmem:[#allocation2 + $0x70] sm:$0xff]  ;;  %v57_v38 = vld [vmem:[#allocation2 + $0x78] sm:$0xff]  ;;  %s1190_s28 = scalar_lea.vmem %s887_s27, 2048  ;;  %p1195_p9 = scmp.lt.s32.totalorder %s887_s27, %s887_s27 }
  0x1e   :  { %1023 = vmatmul.mubr.msk.f32.gmra.mrb[2].mxu0 %vm67_vm0, %v29_v14  ;;  %1035 = vmatmul.mubr.msk.f32.gmra.mrb[2].mxu1 %vm67_vm0, %v37_v15  ;;  %v1147_v36 = vpack.c.bf16 %v55_v35, %v54_v33  ;;  %v1151_v39 = vpack.c.bf16 %v57_v38, %v56_v37  ;;  %v898_v40 = vld [vmem:[#allocation2 + $0x90] ss:$0 sm:$0xff]  ;;  %v915_v28 = vld [vmem:[#allocation2 + $0x98] ss:$0 sm:$0xff]  ;;  %p1191_p8 = scmp.ne.s32.totalorder %s887_s27, %s1190_s28  ;;  %p1196_p10 = scmp.lt.s32.totalorder %s1190_s28, %s1190_s28 }
  0x1f   :  { %1025 = vmatprep.mubr.msk.f32.mxu0 %vm67_vm0, %v30_v16  ;;  %1037 = vmatprep.mubr.msk.f32.mxu1 %vm67_vm0, %v38_v17 }
  0x20   :  { %1134 = vmatpush3.bf16.msra.mxu1 %v1131_v18  ;;  %1144 = vmatprep.subr.bf16.mxu0 %v1143_v34  ;;  %p1197_p11 = por %p1196_p10, %p1195_p9 }
  0x21   :  { %1136 = vmatprep.subr.bf16.mxu1 %v1135_v25  ;;  %1146 = vmatpush3.bf16.msra.mxu0 %v1143_v34 }
  0x22   :  { %1026 = vmatmul.mubr.msk.f32.gmra.mrb[4].mxu0 %vm67_vm0, %v31_v21  ;;  %1038 = vmatmul.mubr.msk.f32.gmra.mrb[4].mxu1 %vm67_vm0, %v39_v22  ;;  %p1198_p12 = pnand %p1197_p11, %p1191_p8 }
  0x23   :  { %1028 = vmatprep.mubr.msk.f32.mxu0 %vm67_vm0, %v32_v23  ;;  %1040 = vmatprep.mubr.msk.f32.mxu1 %vm67_vm0, %v40_v24 }
  0x24   :  { %1138 = vmatpush3.bf16.msra.mxu1 %v1135_v25  ;;  %1148 = vmatprep.subr.bf16.mxu0 %v1147_v36  ;;  %v58_v25 = vld [vmem:[#allocation2 + $0x80] sm:$0xff] }
  0x25   :  { %1140 = vmatprep.subr.bf16.mxu1 %v1139_v30  ;;  %1150 = vmatpush3.bf16.msra.mxu0 %v1147_v36 }
  0x26   :  { %1029 = vmatmul.mubr.msk.f32.gmra.mrb[6].mxu0 %vm67_vm0, %v33_v26  ;;  %1041 = vmatmul.mubr.msk.f32.gmra.mrb[6].mxu1 %vm67_vm0, %v41_v27  ;;  %v59_v26 = vld [vmem:[#allocation2 + $0x88] sm:$0xff] }
  0x27   :  { %1152 = vmatprep.subr.bf16.mxu0 %v1151_v39  ;;  %v1155_v27 = vpack.c.bf16 %v59_v26, %v58_v25 }
  0x28   :  { %1142 = vmatpush3.bf16.msra.mxu1 %v1139_v30 }
  0x29   :  { %1154 = vmatpush3.bf16.msra.mxu0 %v1151_v39 }
  0x2a   :  { %1156 = vmatprep.subr.bf16.mxu0 %v1155_v27 }
  0x2d   :  { %1158 = vmatpush3.bf16.msra.mxu0 %v1155_v27 }
  0xed   :  { %v1021_v41 = vpop.f32.mrb[0].mxu0  ;;  %v1033_v42 = vpop.f32.mrb[0].mxu1 }
  0xee   :  { %v188_v43 = vadd.f32 %v1021_v41, %v898_v40  ;;  %v182_v44 = vpop.f32.mrb[1].mxu0  ;;  %v222_v45 = vpop.f32.mrb[1].mxu1  ;;  %v228_v9 = vadd.f32 %v1033_v42, %v898_v40 }
  0xef   :  { %v183_v46 = vadd.f32 %v898_v40, %v182_v44  ;;  %v223_v2 = vadd.f32 %v898_v40, %v222_v45 }
  0xf0   :  { %v262_v50 = vmax.f32 %v188_v43, 0.0  ;;  %v270_v13 = vmax.f32 %v228_v9, 0.0 }
  0xf1   :  { %v261_v47 = vmax.f32 %v183_v46, 0.0  ;;  %v1024_v48 = vpop.f32.mrb[2].mxu0  ;;  %v1036_v49 = vpop.f32.mrb[2].mxu1  ;;  %v269_v11 = vmax.f32 %v223_v2, 0.0 }
  0xf2   :  { %v198_v51 = vadd.f32 %v1024_v48, %v898_v40  ;;  %v192_v52 = vpop.f32.mrb[3].mxu0  ;;  %v232_v53 = vpop.f32.mrb[3].mxu1  ;;  %v238_v14 = vadd.f32 %v1036_v49, %v898_v40 }
  0xf3   :  { %v193_v54 = vadd.f32 %v898_v40, %v192_v52  ;;  %1059 = vmatprep.mubr.msk.f32.mxu1 %vm281_vm1, %v261_v47  ;;  %v233_v12 = vadd.f32 %v898_v40, %v232_v53 }
  0xf4   :  { %1060 = vmatmul.mubr.msk.f32.vlgmr.msra.gmra.mrb[8].mxu1 %vm281_vm1, %v262_v50  ;;  %v264_v58 = vmax.f32 %v198_v51, 0.0  ;;  %v272_v17 = vmax.f32 %v238_v14, 0.0 }
  0xf5   :  { %v263_v55 = vmax.f32 %v193_v54, 0.0  ;;  %v1027_v56 = vpop.f32.mrb[4].mxu0  ;;  %v1039_v57 = vpop.f32.mrb[4].mxu1  ;;  %v271_v15 = vmax.f32 %v233_v12, 0.0 }
  0xf6   :  { %v208_v59 = vadd.f32 %v1027_v56, %v898_v40  ;;  %v202_v60 = vpop.f32.mrb[5].mxu0  ;;  %v242_v61 = vpop.f32.mrb[5].mxu1  ;;  %v248_v18 = vadd.f32 %v1039_v57, %v898_v40 }
  0xf7   :  { %v203_v62 = vadd.f32 %v898_v40, %v202_v60  ;;  %1062 = vmatprep.mubr.msk.f32.mxu1 %vm281_vm1, %v263_v55  ;;  %v243_v16 = vadd.f32 %v898_v40, %v242_v61 }
  0xf8   :  { %v266_v63 = vmax.f32 %v208_v59, 0.0  ;;  %1063 = vmatmul.mubr.msk.f32.gmra.mrb[10].mxu1 %vm281_vm1, %v264_v58  ;;  %v274_v21 = vmax.f32 %v248_v18, 0.0 }
  0xf9   :  { %v265_v0 = vmax.f32 %v203_v62, 0.0  ;;  %v1030_v1 = vpop.f32.mrb[6].mxu0  ;;  %v1042_v3 = vpop.f32.mrb[6].mxu1  ;;  %v273_v19 = vmax.f32 %v243_v16, 0.0 }
  0xfa   :  { %v218_v4 = vadd.f32 %v1030_v1, %v898_v40  ;;  %v212_v5 = vpop.f32.mrb[7].mxu0  ;;  %v252_v6 = vpop.f32.mrb[7].mxu1  ;;  %v258_v22 = vadd.f32 %v1042_v3, %v898_v40 }
  0xfb   :  { %v213_v7 = vadd.f32 %v898_v40, %v212_v5  ;;  %1065 = vmatprep.mubr.msk.f32.mxu1 %vm281_vm1, %v265_v0  ;;  %v253_v20 = vadd.f32 %v898_v40, %v252_v6 }
  0xfc   :  { %v268_v8 = vmax.f32 %v218_v4, 0.0  ;;  %1066 = vmatmul.mubr.msk.f32.gmra.mrb[12].mxu1 %vm281_vm1, %v266_v63  ;;  %v276_v24 = vmax.f32 %v258_v22, 0.0 }
  0xfd   :  { %v267_v10 = vmax.f32 %v213_v7, 0.0  ;;  %v275_v23 = vmax.f32 %v253_v20, 0.0 }
  0xff   :  { %1068 = vmatprep.mubr.msk.f32.mxu1 %vm281_vm1, %v267_v10 }
 0x100   :  { %1069 = vmatmul.mubr.msk.f32.gmra.mrb[14].mxu1 %vm281_vm1, %v268_v8 }
 0x101   :  { %1071 = vmatprep.mubr.msk.f32.mxu1 %vm281_vm1, %v269_v11 }
 0x104   :  { %1072 = vmatmul.mubr.msk.f32.gmra.mrb[16].mxu1 %vm281_vm1, %v270_v13  ;;  %v1347_v13 = vld [vmem:[#allocation2 + $0xa0] ss:$0 sm:$0xff] }
 0x105   :  { %1074 = vmatprep.mubr.msk.f32.mxu1 %vm281_vm1, %v271_v15 }
 0x108   :  { %1075 = vmatmul.mubr.msk.f32.gmra.mrb[18].mxu1 %vm281_vm1, %v272_v17 }
 0x109   :  { %1077 = vmatprep.mubr.msk.f32.mxu1 %vm281_vm1, %v273_v19 }
 0x10c   :  { %1078 = vmatmul.mubr.msk.f32.gmra.mrb[20].mxu1 %vm281_vm1, %v274_v21 }
 0x10d   :  { %1080 = vmatprep.mubr.msk.f32.mxu1 %vm281_vm1, %v275_v23 }
 0x110   :  { %1081 = vmatmul.mubr.msk.f32.gmra.mrb[22].mxu1 %vm281_vm1, %v276_v24 }
 0x1c7   :  { %v1061_v29 = vpop.f32.mrb[8].mxu1 }
 0x1c8   :  { %v402_v30 = vadd.f32 %v1061_v29, %v915_v28  ;;  %v396_v31 = vpop.f32.mrb[9].mxu1 }
 0x1c9   :  { %v397_v32 = vadd.f32 %v915_v28, %v396_v31 }
 0x1ca   :  { %v476_v35 = vmax.f32 %v402_v30, 0.0 }
 0x1cb   :  { %v475_v33 = vmax.f32 %v397_v32, 0.0  ;;  %v1064_v34 = vpop.f32.mrb[10].mxu1 }
 0x1cc   :  { %v412_v36 = vadd.f32 %v1064_v34, %v915_v28  ;;  %v406_v37 = vpop.f32.mrb[11].mxu1 }
 0x1cd   :  { %v407_v38 = vadd.f32 %v915_v28, %v406_v37  ;;  %1099 = vmatprep.mubr.msk.f32.mxu0 %vm281_vm1, %v475_v33 }
 0x1ce   :  { %1100 = vmatmul.mubr.msk.f32.vlgmr.msra.gmra.mrb[8].mxu0 %vm281_vm1, %v476_v35  ;;  %v478_v41 = vmax.f32 %v412_v36, 0.0 }
 0x1cf   :  { %v477_v39 = vmax.f32 %v407_v38, 0.0  ;;  %v1067_v40 = vpop.f32.mrb[12].mxu1 }
 0x1d0   :  { %v422_v42 = vadd.f32 %v1067_v40, %v915_v28  ;;  %v416_v43 = vpop.f32.mrb[13].mxu1 }
 0x1d1   :  { %v417_v44 = vadd.f32 %v915_v28, %v416_v43  ;;  %1102 = vmatprep.mubr.msk.f32.mxu0 %vm281_vm1, %v477_v39 }
 0x1d2   :  { %v480_v45 = vmax.f32 %v422_v42, 0.0  ;;  %1103 = vmatmul.mubr.msk.f32.gmra.mrb[10].mxu0 %vm281_vm1, %v478_v41 }
 0x1d3   :  { %v479_v46 = vmax.f32 %v417_v44, 0.0  ;;  %v1070_v47 = vpop.f32.mrb[14].mxu1 }
 0x1d4   :  { %v432_v48 = vadd.f32 %v1070_v47, %v915_v28  ;;  %v426_v49 = vpop.f32.mrb[15].mxu1  ;;  %v1219_v47 = vmov 8  }
 0x1d5   :  { %v427_v50 = vadd.f32 %v915_v28, %v426_v49  ;;  %1105 = vmatprep.mubr.msk.f32.mxu0 %vm281_vm1, %v479_v46  ;;  %1166 = vset.pattern.permute.xlu1 %v1219_v47 }
 0x1d6   :  { %v482_v51 = vmax.f32 %v432_v48, 0.0  ;;  %1106 = vmatmul.mubr.msk.f32.gmra.mrb[12].mxu0 %vm281_vm1, %v480_v45  ;;  %1167 = vset.pattern.permute.xlu0 %v1219_v47 }
 0x1d7   :  { %v481_v52 = vmax.f32 %v427_v50, 0.0  ;;  %v1073_v53 = vpop.f32.mrb[16].mxu1 }
 0x1d8   :  { %v442_v54 = vadd.f32 %v1073_v53, %v915_v28  ;;  %v436_v55 = vpop.f32.mrb[17].mxu1 }
 0x1d9   :  { %v437_v56 = vadd.f32 %v915_v28, %v436_v55  ;;  %1108 = vmatprep.mubr.msk.f32.mxu0 %vm281_vm1, %v481_v52 }
 0x1da   :  { %v484_v57 = vmax.f32 %v442_v54, 0.0  ;;  %1109 = vmatmul.mubr.msk.f32.gmra.mrb[14].mxu0 %vm281_vm1, %v482_v51 }
 0x1db   :  { %v483_v58 = vmax.f32 %v437_v56, 0.0  ;;  %v1076_v59 = vpop.f32.mrb[18].mxu1 }
 0x1dc   :  { %v452_v60 = vadd.f32 %v1076_v59, %v915_v28  ;;  %v446_v61 = vpop.f32.mrb[19].mxu1 }
 0x1dd   :  { %v447_v62 = vadd.f32 %v915_v28, %v446_v61  ;;  %1111 = vmatprep.mubr.msk.f32.mxu0 %vm281_vm1, %v483_v58 }
 0x1de   :  { %v486_v63 = vmax.f32 %v452_v60, 0.0  ;;  %1112 = vmatmul.mubr.msk.f32.gmra.mrb[16].mxu0 %vm281_vm1, %v484_v57 }
 0x1df   :  { %v485_v0 = vmax.f32 %v447_v62, 0.0  ;;  %v1079_v1 = vpop.f32.mrb[20].mxu1 }
 0x1e0   :  { %v462_v2 = vadd.f32 %v1079_v1, %v915_v28  ;;  %v456_v3 = vpop.f32.mrb[21].mxu1 }
 0x1e1   :  { %v457_v4 = vadd.f32 %v915_v28, %v456_v3  ;;  %1114 = vmatprep.mubr.msk.f32.mxu0 %vm281_vm1, %v485_v0 }
 0x1e2   :  { %v488_v5 = vmax.f32 %v462_v2, 0.0  ;;  %1115 = vmatmul.mubr.msk.f32.gmra.mrb[18].mxu0 %vm281_vm1, %v486_v63 }
 0x1e3   :  { %v487_v6 = vmax.f32 %v457_v4, 0.0  ;;  %v1082_v7 = vpop.f32.mrb[22].mxu1 }
 0x1e4   :  { %v472_v8 = vadd.f32 %v1082_v7, %v915_v28  ;;  %v466_v9 = vpop.f32.mrb[23].mxu1 }
 0x1e5   :  { %v467_v10 = vadd.f32 %v915_v28, %v466_v9  ;;  %1117 = vmatprep.mubr.msk.f32.mxu0 %vm281_vm1, %v487_v6 }
 0x1e6   :  { %v490_v11 = vmax.f32 %v472_v8, 0.0  ;;  %1118 = vmatmul.mubr.msk.f32.gmra.mrb[20].mxu0 %vm281_vm1, %v488_v5 }
 0x1e7   :  { %v489_v12 = vmax.f32 %v467_v10, 0.0 }
 0x1e9   :  { %1120 = vmatprep.mubr.msk.f32.mxu0 %vm281_vm1, %v489_v12 }
 0x1ea   :  { %1121 = vmatmul.mubr.msk.f32.gmra.mrb[22].mxu0 %vm281_vm1, %v490_v11 }
 0x2a1   :  { %v1101_v14 = vpop.f32.mrb[8].mxu0 }
 0x2a2   :  { %v1350_v15 = vadd.f32 %v1101_v14, %v1347_v13  ;;  %v609_v16 = vpop.f32.mrb[9].mxu0 }
 0x2a3   :  { %v1353_v17 = vadd.f32 %v1347_v13, %v609_v16 }
 0x2a4   :  { %v692_v18 = vsel %vm688_vm2, %v1350_v15, 0.0 }
 0x2a5   :  { %693 = vadd.xlane.f32.xlu0 %v692_v18  ;;  %v1104_v19 = vpop.f32.mrb[10].mxu0  ;;  %v689_v24 = vsel %vm688_vm2, %v1353_v17, 0.0 }
 0x2a6   :  { %v1358_v20 = vadd.f32 %v1104_v19, %v1347_v13  ;;  %v619_v21 = vpop.f32.mrb[11].mxu0 }
 0x2a7   :  { %v1361_v22 = vadd.f32 %v1347_v13, %v619_v21 }
 0x2a8   :  { %v698_v23 = vsel %vm688_vm2, %v1358_v20, 0.0 }
 0x2a9   :  { %699 = vadd.xlane.f32.xlu1 %v698_v23  ;;  %v1107_v25 = vpop.f32.mrb[12].mxu0  ;;  %690 = vadd.xlane.f32.xlu0 %v689_v24  ;;  %v695_v29 = vsel %vm688_vm2, %v1361_v22, 0.0 }
 0x2aa   :  { %v629_v26 = vpop.f32.mrb[13].mxu0  ;;  %v1371_v28 = vadd.f32 %v1107_v25, %v1347_v13 }
 0x2ab   :  { %v1368_v27 = vadd.f32 %v1347_v13, %v629_v26 }
 0x2ac   :  { %v704_v35 = vsel %vm688_vm2, %v1371_v28, 0.0 }
 0x2ad   :  { %v1110_v30 = vpop.f32.mrb[14].mxu0  ;;  %696 = vadd.xlane.f32.xlu1 %v695_v29  ;;  %v701_v31 = vsel %vm688_vm2, %v1368_v27, 0.0 }
 0x2ae   :  { %v1378_v32 = vadd.f32 %v1110_v30, %v1347_v13  ;;  %v639_v33 = vpop.f32.mrb[15].mxu0  ;;  %702 = vadd.xlane.f32.xlu0 %v701_v31 }
 0x2af   :  { %v1381_v34 = vadd.f32 %v1347_v13, %v639_v33 }
 0x2b0   :  { %v710_v40 = vsel %vm688_vm2, %v1378_v32, 0.0 }
 0x2b1   :  { %v1113_v36 = vpop.f32.mrb[16].mxu0  ;;  %705 = vadd.xlane.f32.xlu1 %v704_v35  ;;  %v707_v37 = vsel %vm688_vm2, %v1381_v34, 0.0 }
 0x2b2   :  { %v1388_v38 = vadd.f32 %v1113_v36, %v1347_v13  ;;  %v649_v39 = vpop.f32.mrb[17].mxu0  ;;  %708 = vadd.xlane.f32.xlu0 %v707_v37 }
 0x2b3   :  { %v1393_v41 = vadd.f32 %v1347_v13, %v649_v39 }
 0x2b4   :  { %v716_v46 = vsel %vm688_vm2, %v1388_v38, 0.0 }
 0x2b5   :  { %v1116_v42 = vpop.f32.mrb[18].mxu0  ;;  %711 = vadd.xlane.f32.xlu1 %v710_v40  ;;  %v713_v43 = vsel %vm688_vm2, %v1393_v41, 0.0 }
 0x2b6   :  { %v1398_v44 = vadd.f32 %v1116_v42, %v1347_v13  ;;  %v659_v45 = vpop.f32.mrb[19].mxu0  ;;  %714 = vadd.xlane.f32.xlu0 %v713_v43 }
 0x2b7   :  { %v1403_v48 = vadd.f32 %v1347_v13, %v659_v45 }
 0x2b8   :  { %v722_v53 = vsel %vm688_vm2, %v1398_v44, 0.0 }
 0x2b9   :  { %v1119_v49 = vpop.f32.mrb[20].mxu0  ;;  %717 = vadd.xlane.f32.xlu1 %v716_v46  ;;  %v719_v50 = vsel %vm688_vm2, %v1403_v48, 0.0 }
 0x2ba   :  { %v1408_v51 = vadd.f32 %v1119_v49, %v1347_v13  ;;  %v669_v52 = vpop.f32.mrb[21].mxu0  ;;  %720 = vadd.xlane.f32.xlu0 %v719_v50 }
 0x2bb   :  { %v1413_v54 = vadd.f32 %v1347_v13, %v669_v52 }
 0x2bc   :  { %v728_v59 = vsel %vm688_vm2, %v1408_v51, 0.0 }
 0x2bd   :  { %v1122_v55 = vpop.f32.mrb[22].mxu0  ;;  %723 = vadd.xlane.f32.xlu1 %v722_v53  ;;  %v725_v56 = vsel %vm688_vm2, %v1413_v54, 0.0 }
 0x2be   :  { %v1418_v57 = vadd.f32 %v1122_v55, %v1347_v13  ;;  %v679_v58 = vpop.f32.mrb[23].mxu0  ;;  %726 = vadd.xlane.f32.xlu0 %v725_v56 }
 0x2bf   :  { %v1423_v60 = vadd.f32 %v1347_v13, %v679_v58 }
 0x2c0   :  { %v734_v62 = vsel %vm688_vm2, %v1418_v57, 0.0 }
 0x2c1   :  { %729 = vadd.xlane.f32.xlu1 %v728_v59  ;;  %v731_v61 = vsel %vm688_vm2, %v1423_v60, 0.0 }
 0x2c2   :  { %732 = vadd.xlane.f32.xlu0 %v731_v61 }
 0x2c5   :  { %735 = vadd.xlane.f32.xlu1 %v734_v62 }
 0x332   :  { %v694_v63 = vpop.xlane.xlu0 %693 }
 0x333   :  { %v738_v0 = vmul.f32 0.125, %v694_v63 }
 0x335   :  { %v754_v1 = vsub.f32 %v1350_v15, %v738_v0 }
 0x336   :  { %v700_v2 = vpop.xlane.xlu1 %699  ;;  %v691_v3 = vpop.xlane.xlu0 %690 }
 0x337   :  { %v740_v4 = vmul.f32 0.125, %v700_v2  ;;  %v737_v5 = vmul.f32 0.125, %v691_v3  ;;  %776 = vperm.xlu1 %1166, %v754_v1  }
 0x339   :  { %v756_v6 = vsub.f32 %v1358_v20, %v740_v4  ;;  %v753_v7 = vsub.f32 %v1353_v17, %v737_v5 }
 0x33a   :  { %v697_v8 = vpop.xlane.xlu1 %696 }
 0x33b   :  { %v739_v9 = vmul.f32 0.125, %v697_v8  ;;  %786 = vperm.xlu1 %1166, %v756_v6   ;;  %771 = vperm.xlu0 %1167, %v753_v7   ;;  %v703_v10 = vpop.xlane.xlu0 %702 }
 0x33c   :  { %v741_v16 = vmul.f32 0.125, %v703_v10 }
 0x33d   :  { %v755_v11 = vsub.f32 %v1361_v22, %v739_v9 }
 0x33e   :  { %v706_v12 = vpop.xlane.xlu1 %705  ;;  %v757_v23 = vsub.f32 %v1368_v27, %v741_v16 }
 0x33f   :  { %v742_v13 = vmul.f32 0.125, %v706_v12  ;;  %781 = vperm.xlu1 %1166, %v755_v11   ;;  %v709_v14 = vpop.xlane.xlu0 %708 }
 0x340   :  { %v743_v29 = vmul.f32 0.125, %v709_v14 }
 0x341   :  { %v758_v18 = vsub.f32 %v1371_v28, %v742_v13 }
 0x342   :  { %v712_v19 = vpop.xlane.xlu1 %711  ;;  %v759_v37 = vsub.f32 %v1381_v34, %v743_v29 }
 0x343   :  { %796 = vperm.xlu1 %1166, %v758_v18   ;;  %v715_v21 = vpop.xlane.xlu0 %714  ;;  %v744_v24 = vmul.f32 0.125, %v712_v19 }
 0x344   :  { %v745_v39 = vmul.f32 0.125, %v715_v21 }
 0x345   :  { %v760_v30 = vsub.f32 %v1378_v32, %v744_v24 }
 0x346   :  { %v718_v25 = vpop.xlane.xlu1 %717  ;;  %v761_v46 = vsub.f32 %v1393_v41, %v745_v39 }
 0x347   :  { %v746_v26 = vmul.f32 0.125, %v718_v25  ;;  %791 = vperm.xlu1 %1166, %v757_v23   ;;  %v721_v33 = vpop.xlane.xlu0 %720 }
 0x348   :  { %v747_v47 = vmul.f32 0.125, %v721_v33 }
 0x349   :  { %v762_v31 = vsub.f32 %v1388_v38, %v746_v26 }
 0x34a   :  { %v724_v35 = vpop.xlane.xlu1 %723  ;;  %v763_v53 = vsub.f32 %v1403_v48, %v747_v47 }
 0x34b   :  { %v748_v36 = vmul.f32 0.125, %v724_v35  ;;  %816 = vperm.xlu0 %1167, %v762_v31   ;;  %806 = vperm.xlu1 %1166, %v760_v30   ;;  %v727_v45 = vpop.xlane.xlu0 %726 }
 0x34c   :  { %v749_v55 = vmul.f32 0.125, %v727_v45 }
 0x34d   :  { %v764_v40 = vsub.f32 %v1398_v44, %v748_v36 }
 0x34e   :  { %v730_v42 = vpop.xlane.xlu1 %729  ;;  %v765_v59 = vsub.f32 %v1413_v54, %v749_v55 }
 0x34f   :  { %v750_v43 = vmul.f32 0.125, %v730_v42  ;;  %826 = vperm.xlu0 %1167, %v764_v40   ;;  %801 = vperm.xlu1 %1166, %v759_v37   ;;  %v733_v58 = vpop.xlane.xlu0 %732 }
 0x350   :  { %v751_v61 = vmul.f32 0.125, %v733_v58 }
 0x351   :  { %v766_v49 = vsub.f32 %v1408_v51, %v750_v43 }
 0x352   :  { %v736_v50 = vpop.xlane.xlu1 %735  ;;  %v767_v62 = vsub.f32 %v1423_v60, %v751_v61 }
 0x353   :  { %v752_v52 = vmul.f32 0.125, %v736_v50  ;;  %836 = vperm.xlu0 %1167, %v766_v49   ;;  %811 = vperm.xlu1 %1166, %v761_v46  }
 0x355   :  { %v768_v56 = vsub.f32 %v1418_v57, %v752_v52 }
 0x357   :  { %846 = vperm.xlu0 %1167, %v768_v56   ;;  %821 = vperm.xlu1 %1166, %v763_v53  }
 0x35b   :  { %831 = vperm.xlu1 %1166, %v765_v59  }
 0x35f   :  { %841 = vperm.xlu1 %1166, %v767_v62  }
 0x3b6   :  { %v777_v63 = vpop.permute.xlu1 %776 }
 0x3b7   :  { %v850_v0 = vadd.f32 %v777_v63, %v1350_v15 }
 0x3b9   :  { %866 = vst [vmem:[#allocation5 + $0x8] sm:$0xff] %v850_v0 }
 0x3ba   :  { %v787_v1 = vpop.permute.xlu1 %786  ;;  %v772_v2 = vpop.permute.xlu0 %771 }
 0x3bb   :  { %v852_v3 = vadd.f32 %v787_v1, %v1358_v20  ;;  %v849_v4 = vadd.f32 %v772_v2, %v1353_v17 }
 0x3bd   :  { %868 = vst [vmem:[#allocation5 + $0x18] sm:$0xff] %v852_v3  ;;  %865 = vst [vmem:[#allocation5] sm:$0xff] %v849_v4 }
 0x3be   :  { %v782_v5 = vpop.permute.xlu1 %781 }
 0x3bf   :  { %v851_v6 = vadd.f32 %v782_v5, %v1361_v22 }
 0x3c1   :  { %867 = vst [vmem:[#allocation5 + $0x10] sm:$0xff] %v851_v6 }
 0x3c2   :  { %v797_v7 = vpop.permute.xlu1 %796 }
 0x3c3   :  { %v854_v8 = vadd.f32 %v797_v7, %v1371_v28 }
 0x3c5   :  { %870 = vst [vmem:[#allocation5 + $0x28] sm:$0xff] %v854_v8 }
 0x3c6   :  { %v792_v9 = vpop.permute.xlu1 %791 }
 0x3c7   :  { %v853_v15 = vadd.f32 %v792_v9, %v1368_v27 }
 0x3c9   :  { %869 = vst [vmem:[#allocation5 + $0x20] sm:$0xff] %v853_v15 }
 0x3ca   :  { %v807_v10 = vpop.permute.xlu1 %806  ;;  %v817_v11 = vpop.permute.xlu0 %816 }
 0x3cb   :  { %v856_v20 = vadd.f32 %v807_v10, %v1378_v32  ;;  %v858_v17 = vadd.f32 %v817_v11, %v1388_v38 }
 0x3cd   :  { %872 = vst [vmem:[#allocation5 + $0x38] sm:$0xff] %v856_v20  ;;  %874 = vst [vmem:[#allocation5 + $0x48] sm:$0xff] %v858_v17 }
 0x3ce   :  { %v802_v12 = vpop.permute.xlu1 %801  ;;  %v827_v13 = vpop.permute.xlu0 %826 }
 0x3cf   :  { %v855_v22 = vadd.f32 %v802_v12, %v1381_v34  ;;  %v860_v14 = vadd.f32 %v827_v13, %v1398_v44 }
 0x3d1   :  { %871 = vst [vmem:[#allocation5 + $0x30] sm:$0xff] %v855_v22  ;;  %876 = vst [vmem:[#allocation5 + $0x58] sm:$0xff] %v860_v14 }
 0x3d2   :  { %v812_v28 = vpop.permute.xlu1 %811  ;;  %v837_v16 = vpop.permute.xlu0 %836 }
 0x3d3   :  { %v857_v27 = vadd.f32 %v812_v28, %v1393_v41  ;;  %v862_v18 = vadd.f32 %v837_v16, %v1408_v51 }
 0x3d5   :  { %873 = vst [vmem:[#allocation5 + $0x40] sm:$0xff] %v857_v27  ;;  %878 = vst [vmem:[#allocation5 + $0x68] sm:$0xff] %v862_v18 }
 0x3d6   :  { %v822_v32 = vpop.permute.xlu1 %821  ;;  %v847_v38 = vpop.permute.xlu0 %846 }
 0x3d7   :  { %v859_v19 = vadd.f32 %v822_v32, %v1403_v48  ;;  %v864_v21 = vadd.f32 %v847_v38, %v1418_v57 }
 0x3d9   :  { %875 = vst [vmem:[#allocation5 + $0x50] sm:$0xff] %v859_v19  ;;  %880 = vst [vmem:[#allocation5 + $0x78] sm:$0xff] %v864_v21 }
 0x3da   :  { %v832_v34 = vpop.permute.xlu1 %831 }
 0x3db   :  { %v861_v44 = vadd.f32 %v832_v34, %v1413_v54 }
 0x3dd   :  { %877 = vst [vmem:[#allocation5 + $0x60] sm:$0xff] %v861_v44 }
 0x3de   :  { %v842_v23 = vpop.permute.xlu1 %841 }
 0x3df   :  { %v863_v41 = vadd.f32 %v842_v23, %v1423_v60 }
 0x3e1   :  { %879 = vst [vmem:[#allocation5 + $0x70] sm:$0xff] %v863_v41 }
 0x3e2   :  { %1201 = shalt.err (!%p1198_p12)
}
 0x3e3   :  { %s1202_s3 = scalar_lea.hbm %s1478_s2, 2048 }
 0x3e4   :  { %p1203_p13 = scmp.ne.s32.totalorder %s1478_s2, %s1202_s3  ;;  %p1206_p0 = scmp.lt.u32.totalorder %s1202_s3, %s1478_s2 }
 0x3e6   :  { %p1208_p1 = pnand %p1206_p0, %p1203_p13 }
 0x3e8   :  { %1211 = shalt.err (!%p1208_p1)
}
 0x3e9   :  { %892 = dma.vmem_to_hbm [thread:$0]  %s887_s27, 2048, %s1478_s2, [#allocation4], %s1217_s19, %s1217_s19, %s1218_s20  }
 0x3ea   :  { %1214 = dma.done.wait [#allocation4], 2048  }
 0x3eb   :  { %1215 = vsyncadd [#allocation4], 4294965248 }
 0x3ec   :  { %896 = vsyncpa [#allocation3], 1 }
 0x3ed   :  { %897 = vsyncpa [#allocation4], 1 }

</bundles_post_ra>
